<compile_context>
chip_gen: v5e
topology: v5e:2x2
jax: 0.10.0
libtpu: 0.0.40
codegen_flags: <defaults>
</compile_context>

<pallas_src>
import functools

import jax
import jax.numpy as jnp
from jax.experimental import pallas as pl
from jax.experimental.pallas import tpu as pltpu


def _round_up(x, m):
    return -(-x // m) * m


# ----------------------------- glue (plain JAX) -----------------------------

def _im2col_t(x_nhwc, kh, kw, stride, pad):
    """Transposed im2col: returns ([kh*kw*C, N*OH*OW], (N, OH, OW)).

    Column (K) order is (kh, kw, c) — matching a weight laid out as
    (Cout, KH, KW, C) and flattened.  Row (M) order is (N, OH, OW).
    """
    x = jnp.pad(x_nhwc, ((0, 0), (pad, pad), (pad, pad), (0, 0)))
    n, h, w, c = x.shape
    oh = (h - kh) // stride + 1
    ow = (w - kw) // stride + 1
    cols = []
    for i in range(kh):
        for j in range(kw):
            cols.append(x[:, i:i + oh * stride:stride, j:j + ow * stride:stride, :])
    p = jnp.stack(cols, axis=0)                 # (KH*KW, N, OH, OW, C)
    p = jnp.transpose(p, (0, 4, 1, 2, 3))       # (KH*KW, C, N, OH, OW)
    return p.reshape(kh * kw * c, n * oh * ow), (n, oh, ow)


def _prepare_patches(x_nchw, mask_n1hw, kh, kw, stride, pad):
    """im2col of concat(x*mask, mask) along channels -> (K', M) bf16."""
    x_nhwc = jnp.transpose(x_nchw, (0, 2, 3, 1)).astype(jnp.float32)
    m_nhwc = jnp.transpose(mask_n1hw, (0, 2, 3, 1)).astype(jnp.float32)
    xm = x_nhwc * m_nhwc
    # Append the mask as an extra channel: its patch rows are exactly the
    # mask patches, so one matmul yields both conv(x*mask, W) and msum.
    aug = jnp.concatenate([xm, m_nhwc], axis=-1).astype(jnp.bfloat16)
    patches, dims = _im2col_t(aug, kh, kw, stride, pad)   # (kh*kw*(Cin+1), M)
    return patches, dims


def _fold_params(w, b, gamma, beta, rmean, rvar, bn_eps):
    """Fold eval-mode BatchNorm into the conv weight/bias and append the
    msum row (1 on the mask-channel positions of the im2col K ordering)."""
    cout, cin, kh, kw = w.shape
    scale = gamma / jnp.sqrt(rvar + bn_eps)                              # (Cout,)
    w_hwc = jnp.transpose(w, (0, 2, 3, 1))                               # (Cout,KH,KW,Cin)
    w_aug = jnp.pad(w_hwc, ((0, 0), (0, 0), (0, 0), (0, 1)))             # mask chan = 0
    w_mat = w_aug.reshape(cout, kh * kw * (cin + 1)) * scale[:, None]
    msum_row = jnp.tile(jnp.concatenate([jnp.zeros((cin,), jnp.float32),
                                         jnp.ones((1,), jnp.float32)]), kh * kw)
    w_fold = jnp.concatenate([w_mat, msum_row[None, :]], axis=0).astype(jnp.bfloat16)
    b_fold = (b * scale).reshape(cout, 1).astype(jnp.float32)            # (Cout,1)
    bn_shift = (beta - rmean * scale).reshape(cout, 1).astype(jnp.float32)
    return w_fold, b_fold, bn_shift


def _tpu_hw_info():
    """Best-effort (num_tensorcores, physical VMEM bytes per core)."""
    num_tc, vmem_bytes = 1, 64 << 20            # conservative, safe everywhere
    try:
        info = pltpu.get_tpu_info()
        vmem_bytes = int(getattr(info, "vmem_capacity_bytes", vmem_bytes)) or vmem_bytes
        for attr in ("num_cores", "tensorcore_count", "core_count"):
            v = getattr(info, attr, None)
            if v:
                num_tc = max(num_tc, int(v))
                break
    except Exception:
        pass
    try:
        kind = jax.devices()[0].device_kind.lower()
        if any(t in kind for t in ("v7", "tpu7", " 7x")):
            num_tc = max(num_tc, 2)             # v7x: 2 TensorCores per chip
    except Exception:
        pass
    return num_tc, vmem_bytes


# ------------------------------- Pallas kernel -------------------------------

def _pconv_bn_lrelu_kernel(xp_ref, w_ref, b_ref, bnb_ref, out_ref, mout_ref,
                           *, cout, slide_winsize, neg_slope):
    # xp_ref  : (K', TM)     bf16  patches of concat(x*mask, mask), lane-dense
    # w_ref   : (Cout+1, K') bf16  BN-scale-folded weight; last row -> msum
    # b_ref   : (Cout, 1)    f32   BN-scale-folded conv bias
    # bnb_ref : (Cout, 1)    f32   BN shift (beta - mean*scale)
    # out_ref : (Cout, TM)   bf16  activations (lane-dense)
    # mout_ref: (1, TM)      f32   updated mask
    raw = jnp.dot(w_ref[...], xp_ref[...],
                  preferred_element_type=jnp.float32)             # (Cout+1, TM)
    conv = raw[:cout, :]
    msum = raw[cout:cout + 1, :]                                  # exact integer

    hole = msum <= 0.0
    # EUP approx reciprocal: msum is an integer in [1, KH*KW] where used, so
    # the ~2^-12 relative error is negligible.
    ratio = jnp.where(hole, 0.0,
                      slide_winsize * pl.reciprocal(msum + 1e-8, approx=True))
    # (conv*ratio + b)*um + bn_shift  ==  where(hole, bn_shift, conv*ratio + b + bn_shift)
    y = jnp.where(hole, bnb_ref[...], conv * ratio + (b_ref[...] + bnb_ref[...]))
    if neg_slope == 0.0:
        y = jnp.maximum(y, 0.0)
    else:
        y = jnp.where(y >= 0.0, y, neg_slope * y)

    out_ref[...] = y.astype(out_ref.dtype)
    mout_ref[...] = jnp.where(hole, 0.0, 1.0).astype(mout_ref.dtype)


# --------------------------------- wrapper -----------------------------------

def partial_encoder_block(x_nchw, mask_n1hw, params, *, kernel_size=3,
                          stride=2, bn_eps=1e-5, relu_factor=0.0,
                          tile_m_target=None, out_dtype=jnp.bfloat16):
    w, b, gamma, beta, rmean, rvar = params
    cout, cin = w.shape[0], w.shape[1]
    kh = kw = kernel_size
    pad = kernel_size // 2          # "reduce size by half" with stride 2

    patches, (n_, oh, ow) = _prepare_patches(x_nchw, mask_n1hw, kh, kw, stride, pad)
    w_fold, b_fold, bn_shift = _fold_params(w, b, gamma, beta, rmean, rvar, bn_eps)

    k_dim = kh * kw * (cin + 1)
    slide_winsize = float(kh * kw)   # single-channel mask updater
    m_rows = n_ * oh * ow
    out_itemsize = jnp.dtype(out_dtype).itemsize

    # ---- generation-aware tile / grid selection -----------------------------
    num_tc, vmem_phys = _tpu_hw_info()
    m128 = _round_up(m_rows, 128)

    # VMEM per output column: double-buffered bf16 patches, double-buffered
    # outputs (bf16 acts + f32 mask), plus an allowance for the f32 matmul /
    # epilogue intermediates.  Weights counted at 2 copies (worst case).
    col_bytes = (2 * k_dim * 2
                 + 2 * cout * out_itemsize + 2 * 4
                 + 2 * (cout + 1) * 4)
    weight_bytes = (cout + 1) * k_dim * 2 + 2 * cout * 4
    budget = int(0.75 * vmem_phys)
    avail = max(budget - 2 * weight_bytes, col_bytes * 128)
    tile_fit = max((avail // col_bytes) // 128 * 128, 128)

    tile_m = min(m128, tile_fit, 32768)
    if tile_m_target is not None:
        tile_m = min(tile_m, max(_round_up(int(tile_m_target), 128), 128))
    # Only shard the M axis when there is more than one TensorCore (v7x);
    # aim for >= 2 grid steps per core so each core still overlaps DMA/compute.
    if num_tc > 1 and m128 >= 2 * num_tc * 128:
        tile_m = min(tile_m, _round_up(-(-m128 // (2 * num_tc)), 128))

    grid = (pl.cdiv(m_rows, tile_m),)

    needed = (2 * k_dim * tile_m * 2
              + 2 * cout * tile_m * out_itemsize + 2 * tile_m * 4
              + 2 * (cout + 1) * tile_m * 4
              + 2 * weight_bytes)
    vmem_limit = min(int(0.9 * vmem_phys), needed + (8 << 20))
    vmem_limit = max(int(vmem_limit), 16 << 20)

    kernel = functools.partial(_pconv_bn_lrelu_kernel,
                               cout=cout,
                               slide_winsize=slide_winsize,
                               neg_slope=float(relu_factor))

    cost = pl.CostEstimate(
        flops=2 * m_rows * k_dim * (cout + 1),
        transcendentals=0,
        bytes_accessed=(m_rows * k_dim * 2                 # bf16 patch reads
                        + m_rows * cout * out_itemsize     # activations
                        + m_rows * 4                       # mask
                        + weight_bytes))                   # weights / biases

    def _specs(buffered_invariants):
        inv = dict(pipeline_mode=pl.Buffered(1)) if buffered_invariants else {}
        in_specs = [
            pl.BlockSpec((k_dim, tile_m), lambda i: (0, i)),
            pl.BlockSpec((cout + 1, k_dim), lambda i: (0, 0), **inv),
            pl.BlockSpec((cout, 1), lambda i: (0, 0), **inv),
            pl.BlockSpec((cout, 1), lambda i: (0, 0), **inv),
        ]
        out_specs = (
            pl.BlockSpec((cout, tile_m), lambda i: (0, i)),
            pl.BlockSpec((1, tile_m), lambda i: (0, i)),
        )
        return in_specs, out_specs

    def _run(buffered_invariants):
        in_specs, out_specs = _specs(buffered_invariants)
        return pl.pallas_call(
            kernel,
            out_shape=(jax.ShapeDtypeStruct((cout, m_rows), out_dtype),
                       jax.ShapeDtypeStruct((1, m_rows), jnp.float32)),
            grid=grid,
            in_specs=in_specs,
            out_specs=out_specs,
            compiler_params=pltpu.CompilerParams(
                dimension_semantics=("parallel",),
                vmem_limit_bytes=int(vmem_limit)),
            cost_estimate=cost,
        )(patches, w_fold, b_fold, bn_shift)

    try:
        out_flat, mout_flat = _run(hasattr(pl, "Buffered"))
    except Exception:
        # TODO(synk): drop this fallback once pipeline_mode=pl.Buffered(1) on
        # grid-invariant operands is guaranteed on all deployed jax versions.
        out_flat, mout_flat = _run(False)

    # TODO(synk): when chaining encoder blocks, keep the (Cout, N*OH*OW)
    # lane-dense layout instead of this NCHW back-transpose (saves one full
    # HBM pass per layer plus the NHWC transpose at the next layer's input).
    y = out_flat.reshape(cout, n_, oh, ow).transpose(1, 0, 2, 3)        # NCHW
    mask_out = mout_flat.reshape(1, n_, oh, ow).transpose(1, 0, 2, 3)   # (N,1,OH,OW)
    return y, mask_out


# ------------------------------ pure-JAX reference ----------------------------

def _reference(x_nchw, mask_n1hw, params, *, kernel_size=3, stride=2,
               bn_eps=1e-5, relu_factor=0.0):
    w, b, gamma, beta, rmean, rvar = params
    cout, cin = w.shape[0], w.shape[1]
    kh = kw = kernel_size
    pad = kernel_size // 2
    patches, (n_, oh, ow) = _prepare_patches(x_nchw, mask_n1hw, kh, kw, stride, pad)
    w_fold, b_fold, bn_shift = _fold_params(w, b, gamma, beta, rmean, rvar, bn_eps)
    pf = patches.astype(jnp.float32)
    conv = jnp.dot(w_fold[:cout].astype(jnp.float32), pf)               # (Cout, M)
    # msum computed directly from the mask-channel patch rows (independent of
    # the appended weight row used by the kernel).
    msum = jnp.sum(pf.reshape(kh * kw, cin + 1, -1)[:, cin, :],
                   axis=0, keepdims=True)                               # (1, M)
    hole = msum <= 0.0
    ratio = jnp.where(hole, 0.0, float(kh * kw) / (msum + 1e-8))
    um = jnp.where(hole, 0.0, 1.0)
    y = (conv * ratio + b_fold) * um + bn_shift
    y = jnp.where(y >= 0.0, y, relu_factor * y)
    y = y.reshape(cout, n_, oh, ow).transpose(1, 0, 2, 3)
    m_out = um.reshape(1, n_, oh, ow).transpose(1, 0, 2, 3)
    return y, m_out


# ----------------------------------- main -------------------------------------

if __name__ == "__main__":
    key = jax.random.PRNGKey(0)
    k_x, k_m, k_w, k_b, k_g, k_be, k_mu, k_var = jax.random.split(key, 8)

    N, CIN, H, W = 2, 4, 16, 16
    COUT, KSIZE = 8, 3

    x = jax.random.normal(k_x, (N, CIN, H, W), dtype=jnp.float32)
    mask = (jax.random.uniform(k_m, (N, 1, H, W)) > 0.3).astype(jnp.float32)

    # deterministic parameter init (shapes from PartialConv2d + BatchNorm2d)
    w = 0.1 * jax.random.normal(k_w, (COUT, CIN, KSIZE, KSIZE), dtype=jnp.float32)
    b = 0.1 * jax.random.normal(k_b, (COUT,), dtype=jnp.float32)
    gamma = 1.0 + 0.1 * jax.random.normal(k_g, (COUT,), dtype=jnp.float32)
    beta = 0.1 * jax.random.normal(k_be, (COUT,), dtype=jnp.float32)
    rmean = 0.1 * jax.random.normal(k_mu, (COUT,), dtype=jnp.float32)
    rvar = jax.random.uniform(k_var, (COUT,), minval=0.5, maxval=1.5)
    params = (w, b, gamma, beta, rmean, rvar)

    y, mask_out = partial_encoder_block(x, mask, params,
                                        kernel_size=KSIZE, stride=2,
                                        relu_factor=0.0)
    y = jax.block_until_ready(y)
    mask_out = jax.block_until_ready(mask_out)

    y_ref, mask_ref = _reference(x, mask, params, kernel_size=KSIZE, stride=2,
                                 relu_factor=0.0)
    assert y.shape == (N, COUT, H // 2, W // 2)
    assert mask_out.shape == (N, 1, H // 2, W // 2)
    # bf16 activation writeback + approx reciprocal -> relaxed tolerance
    assert jnp.allclose(y.astype(jnp.float32), y_ref, atol=3e-2, rtol=3e-2)
    assert jnp.allclose(mask_out, mask_ref)

    print("KERNEL_OK")
</pallas_src>

<mosaic_0001>
module attributes {stable_mosaic.version = 11 : i64} {
  func.func @_pconv_bn_lrelu_kernel(%arg0: i32, %arg1: memref<45x128xbf16, #tpu.memory_space<vmem>>, %arg2: memref<9x45xbf16, #tpu.memory_space<vmem>>, %arg3: memref<8x1xf32, #tpu.memory_space<vmem>>, %arg4: memref<8x1xf32, #tpu.memory_space<vmem>>, %arg5: memref<8x128xbf16, #tpu.memory_space<vmem>>, %arg6: memref<1x128xf32, #tpu.memory_space<vmem>>) attributes {dimension_semantics = [#tpu.dimension_semantics<parallel>], iteration_bounds = array<i64: 1>, scalar_prefetch = 0 : i64, scratch_operands = 0 : i64, tpu.core_type = #tpu.core_type<tc>, window_params = [{transform_indices = @transform_0, window_bounds = array<i64: 45, 128>}, {pipeline_mode = #tpu.pipeline_mode<synchronous>, transform_indices = @transform_1, window_bounds = array<i64: 9, 45>}, {pipeline_mode = #tpu.pipeline_mode<synchronous>, transform_indices = @transform_2, window_bounds = array<i64: 8, 1>}, {pipeline_mode = #tpu.pipeline_mode<synchronous>, transform_indices = @transform_3, window_bounds = array<i64: 8, 1>}, {transform_indices = @transform_4, window_bounds = array<i64: 8, 128>}, {transform_indices = @transform_5, window_bounds = array<i64: 1, 128>}]} {
    %c0 = arith.constant 0 : index
    %c0_0 = arith.constant 0 : index
    %0 = vector.load %arg2[%c0, %c0_0] : memref<9x45xbf16, #tpu.memory_space<vmem>>, vector<9x45xbf16>
    %c0_1 = arith.constant 0 : index
    %c0_2 = arith.constant 0 : index
    %1 = vector.load %arg1[%c0_1, %c0_2] : memref<45x128xbf16, #tpu.memory_space<vmem>>, vector<45x128xbf16>
    %cst = arith.constant dense<0.000000e+00> : vector<9x128xf32>
    %2 = tpu.matmul %0, %1, %cst {dimension_numbers = #tpu.dot_dimension_numbers<[1], [0], [0], [1], [0, 0, 1, 1], [], []>} : vector<9x45xbf16>, vector<45x128xbf16>, vector<9x128xf32> -> vector<9x128xf32>
    %3 = vector.extract_strided_slice %2 {offsets = [0, 0], sizes = [8, 128], strides = [1, 1]} : vector<9x128xf32> to vector<8x128xf32>
    %4 = vector.extract_strided_slice %2 {offsets = [8, 0], sizes = [1, 128], strides = [1, 1]} : vector<9x128xf32> to vector<1x128xf32>
    %cst_3 = arith.constant 0.000000e+00 : f32
    %5 = vector.broadcast %cst_3 : f32 to vector<1x128xf32>
    %6 = arith.cmpf ole, %4, %5 : vector<1x128xf32>
    %cst_4 = arith.constant 9.99999993E-9 : f32
    %7 = vector.broadcast %cst_4 : f32 to vector<1x128xf32>
    %8 = arith.addf %4, %7 : vector<1x128xf32>
    %9 = tpu.reciprocal %8 {approx = true} : vector<1x128xf32> -> vector<1x128xf32>
    %cst_5 = arith.constant 9.000000e+00 : f32
    %10 = vector.broadcast %cst_5 : f32 to vector<1x128xf32>
    %11 = arith.mulf %10, %9 : vector<1x128xf32>
    %cst_6 = arith.constant 0.000000e+00 : f32
    %12 = vector.broadcast %cst_6 : f32 to vector<1x128xf32>
    %13 = arith.select %6, %12, %11 : vector<1x128xi1>, vector<1x128xf32>
    %c0_7 = arith.constant 0 : index
    %c0_8 = arith.constant 0 : index
    %14 = vector.load %arg4[%c0_7, %c0_8] : memref<8x1xf32, #tpu.memory_space<vmem>>, vector<8x1xf32>
    %15 = vector.broadcast %13 : vector<1x128xf32> to vector<8x128xf32>
    %16 = arith.mulf %3, %15 : vector<8x128xf32>
    %c0_9 = arith.constant 0 : index
    %c0_10 = arith.constant 0 : index
    %17 = vector.load %arg3[%c0_9, %c0_10] : memref<8x1xf32, #tpu.memory_space<vmem>>, vector<8x1xf32>
    %c0_11 = arith.constant 0 : index
    %c0_12 = arith.constant 0 : index
    %18 = vector.load %arg4[%c0_11, %c0_12] : memref<8x1xf32, #tpu.memory_space<vmem>>, vector<8x1xf32>
    %19 = arith.addf %17, %18 : vector<8x1xf32>
    %20 = vector.broadcast %19 : vector<8x1xf32> to vector<8x128xf32>
    %21 = arith.addf %16, %20 : vector<8x128xf32>
    %22 = vector.shape_cast %6 : vector<1x128xi1> to vector<1x128xi1>
    %23 = vector.broadcast %22 : vector<1x128xi1> to vector<8x128xi1>
    %24 = vector.shape_cast %14 : vector<8x1xf32> to vector<8x1xf32>
    %25 = vector.broadcast %24 : vector<8x1xf32> to vector<8x128xf32>
    %26 = arith.select %23, %25, %21 : vector<8x128xi1>, vector<8x128xf32>
    %cst_13 = arith.constant 0.000000e+00 : f32
    %27 = vector.broadcast %cst_13 : f32 to vector<8x128xf32>
    %28 = arith.maximumf %26, %27 : vector<8x128xf32>
    %29 = arith.truncf %28 : vector<8x128xf32> to vector<8x128xbf16>
    %c0_14 = arith.constant 0 : index
    %c0_15 = arith.constant 0 : index
    %30 = vector.load %arg5[%c0_14, %c0_15] : memref<8x128xbf16, #tpu.memory_space<vmem>>, vector<8x128xbf16>
    tpu.vector_store %arg5[%c0_14, %c0_15], %29 {strides = array<i32>} : memref<8x128xbf16, #tpu.memory_space<vmem>>, vector<8x128xbf16>,
    %cst_16 = arith.constant 0.000000e+00 : f32
    %cst_17 = arith.constant 1.000000e+00 : f32
    %31 = vector.broadcast %cst_16 : f32 to vector<1x128xf32>
    %32 = vector.broadcast %cst_17 : f32 to vector<1x128xf32>
    %33 = arith.select %6, %31, %32 : vector<1x128xi1>, vector<1x128xf32>
    %c0_18 = arith.constant 0 : index
    %c0_19 = arith.constant 0 : index
    %34 = vector.load %arg6[%c0_18, %c0_19] : memref<1x128xf32, #tpu.memory_space<vmem>>, vector<1x128xf32>
    tpu.vector_store %arg6[%c0_18, %c0_19], %33 {strides = array<i32>} : memref<1x128xf32, #tpu.memory_space<vmem>>, vector<1x128xf32>,
    return
  }
  func.func @transform_0(%arg0: i32) -> (i32, i32) {
    %c0_i32 = arith.constant 0 : i32
    %c0_i32_0 = arith.constant 0 : i32
    return %c0_i32, %arg0 : i32, i32
  }
  func.func @transform_1(%arg0: i32) -> (i32, i32) {
    %c0_i32 = arith.constant 0 : i32
    %c0_i32_0 = arith.constant 0 : i32
    %c0_i32_1 = arith.constant 0 : i32
    return %c0_i32, %c0_i32_0 : i32, i32
  }
  func.func @transform_2(%arg0: i32) -> (i32, i32) {
    %c0_i32 = arith.constant 0 : i32
    %c0_i32_0 = arith.constant 0 : i32
    %c0_i32_1 = arith.constant 0 : i32
    return %c0_i32, %c0_i32_0 : i32, i32
  }
  func.func @transform_3(%arg0: i32) -> (i32, i32) {
    %c0_i32 = arith.constant 0 : i32
    %c0_i32_0 = arith.constant 0 : i32
    %c0_i32_1 = arith.constant 0 : i32
    return %c0_i32, %c0_i32_0 : i32, i32
  }
  func.func @transform_4(%arg0: i32) -> (i32, i32) {
    %c0_i32 = arith.constant 0 : i32
    %c0_i32_0 = arith.constant 0 : i32
    return %c0_i32, %arg0 : i32, i32
  }
  func.func @transform_5(%arg0: i32) -> (i32, i32) {
    %c0_i32 = arith.constant 0 : i32
    %c0_i32_0 = arith.constant 0 : i32
    return %c0_i32, %arg0 : i32, i32
  }
}

module attributes {stable_mosaic.version = 11 : i64} {
  func.func @_pconv_bn_lrelu_kernel(%arg0: i32, %arg1: memref<45x128xbf16, #tpu.memory_space<vmem>>, %arg2: memref<9x45xbf16, #tpu.memory_space<vmem>>, %arg3: memref<8x1xf32, #tpu.memory_space<vmem>>, %arg4: memref<8x1xf32, #tpu.memory_space<vmem>>, %arg5: memref<8x128xbf16, #tpu.memory_space<vmem>>, %arg6: memref<1x128xf32, #tpu.memory_space<vmem>>) attributes {dimension_semantics = [#tpu.dimension_semantics<parallel>], iteration_bounds = array<i64: 1>, scalar_prefetch = 0 : i64, scratch_operands = 0 : i64, tpu.core_type = #tpu.core_type<tc>, window_params = [{transform_indices = @transform_0, window_bounds = array<i64: 45, 128>}, {pipeline_mode = #tpu.pipeline_mode<synchronous>, transform_indices = @transform_1, window_bounds = array<i64: 9, 45>}, {pipeline_mode = #tpu.pipeline_mode<synchronous>, transform_indices = @transform_2, window_bounds = array<i64: 8, 1>}, {pipeline_mode = #tpu.pipeline_mode<synchronous>, transform_indices = @transform_3, window_bounds = array<i64: 8, 1>}, {transform_indices = @transform_4, window_bounds = array<i64: 8, 128>}, {transform_indices = @transform_5, window_bounds = array<i64: 1, 128>}]} {
    %c0 = arith.constant 0 : index
    %c0_0 = arith.constant 0 : index
    %0 = vector.load %arg2[%c0, %c0_0] : memref<9x45xbf16, #tpu.memory_space<vmem>>, vector<9x45xbf16>
    %c0_1 = arith.constant 0 : index
    %c0_2 = arith.constant 0 : index
    %1 = vector.load %arg1[%c0_1, %c0_2] : memref<45x128xbf16, #tpu.memory_space<vmem>>, vector<45x128xbf16>
    %cst = arith.constant dense<0.000000e+00> : vector<9x128xf32>
    %2 = tpu.matmul %0, %1, %cst {dimension_numbers = #tpu.dot_dimension_numbers<[1], [0], [0], [1], [0, 0, 1, 1], [], []>} : vector<9x45xbf16>, vector<45x128xbf16>, vector<9x128xf32> -> vector<9x128xf32>
    %3 = vector.extract_strided_slice %2 {offsets = [0, 0], sizes = [8, 128], strides = [1, 1]} : vector<9x128xf32> to vector<8x128xf32>
    %4 = vector.extract_strided_slice %2 {offsets = [8, 0], sizes = [1, 128], strides = [1, 1]} : vector<9x128xf32> to vector<1x128xf32>
    %cst_3 = arith.constant 0.000000e+00 : f32
    %5 = vector.broadcast %cst_3 : f32 to vector<1x128xf32>
    %6 = arith.cmpf ole, %4, %5 : vector<1x128xf32>
    %cst_4 = arith.constant 9.99999993E-9 : f32
    %7 = vector.broadcast %cst_4 : f32 to vector<1x128xf32>
    %8 = arith.addf %4, %7 : vector<1x128xf32>
    %9 = tpu.reciprocal %8 {approx = true} : vector<1x128xf32> -> vector<1x128xf32>
    %cst_5 = arith.constant 9.000000e+00 : f32
    %10 = vector.broadcast %cst_5 : f32 to vector<1x128xf32>
    %11 = arith.mulf %10, %9 : vector<1x128xf32>
    %cst_6 = arith.constant 0.000000e+00 : f32
    %12 = vector.broadcast %cst_6 : f32 to vector<1x128xf32>
    %13 = arith.select %6, %12, %11 : vector<1x128xi1>, vector<1x128xf32>
    %c0_7 = arith.constant 0 : index
    %c0_8 = arith.constant 0 : index
    %14 = vector.load %arg4[%c0_7, %c0_8] : memref<8x1xf32, #tpu.memory_space<vmem>>, vector<8x1xf32>
    %15 = vector.broadcast %13 : vector<1x128xf32> to vector<8x128xf32>
    %16 = arith.mulf %3, %15 : vector<8x128xf32>
    %c0_9 = arith.constant 0 : index
    %c0_10 = arith.constant 0 : index
    %17 = vector.load %arg3[%c0_9, %c0_10] : memref<8x1xf32, #tpu.memory_space<vmem>>, vector<8x1xf32>
    %c0_11 = arith.constant 0 : index
    %c0_12 = arith.constant 0 : index
    %18 = vector.load %arg4[%c0_11, %c0_12] : memref<8x1xf32, #tpu.memory_space<vmem>>, vector<8x1xf32>
    %19 = arith.addf %17, %18 : vector<8x1xf32>
    %20 = vector.broadcast %19 : vector<8x1xf32> to vector<8x128xf32>
    %21 = arith.addf %16, %20 : vector<8x128xf32>
    %22 = vector.shape_cast %6 : vector<1x128xi1> to vector<1x128xi1>
    %23 = vector.broadcast %22 : vector<1x128xi1> to vector<8x128xi1>
    %24 = vector.shape_cast %14 : vector<8x1xf32> to vector<8x1xf32>
    %25 = vector.broadcast %24 : vector<8x1xf32> to vector<8x128xf32>
    %26 = arith.select %23, %25, %21 : vector<8x128xi1>, vector<8x128xf32>
    %cst_13 = arith.constant 0.000000e+00 : f32
    %27 = vector.broadcast %cst_13 : f32 to vector<8x128xf32>
    %28 = arith.maximumf %26, %27 : vector<8x128xf32>
    %29 = arith.truncf %28 : vector<8x128xf32> to vector<8x128xbf16>
    %c0_14 = arith.constant 0 : index
    %c0_15 = arith.constant 0 : index
    %30 = vector.load %arg5[%c0_14, %c0_15] : memref<8x128xbf16, #tpu.memory_space<vmem>>, vector<8x128xbf16>
    tpu.vector_store %arg5[%c0_14, %c0_15], %29 {strides = array<i32>} : memref<8x128xbf16, #tpu.memory_space<vmem>>, vector<8x128xbf16>,
    %cst_16 = arith.constant 0.000000e+00 : f32
    %cst_17 = arith.constant 1.000000e+00 : f32
    %31 = vector.broadcast %cst_16 : f32 to vector<1x128xf32>
    %32 = vector.broadcast %cst_17 : f32 to vector<1x128xf32>
    %33 = arith.select %6, %31, %32 : vector<1x128xi1>, vector<1x128xf32>
    %c0_18 = arith.constant 0 : index
    %c0_19 = arith.constant 0 : index
    %34 = vector.load %arg6[%c0_18, %c0_19] : memref<1x128xf32, #tpu.memory_space<vmem>>, vector<1x128xf32>
    tpu.vector_store %arg6[%c0_18, %c0_19], %33 {strides = array<i32>} : memref<1x128xf32, #tpu.memory_space<vmem>>, vector<1x128xf32>,
    return
  }
  func.func @transform_0(%arg0: i32) -> (i32, i32) {
    %c0_i32 = arith.constant 0 : i32
    %c0_i32_0 = arith.constant 0 : i32
    return %c0_i32, %arg0 : i32, i32
  }
  func.func @transform_1(%arg0: i32) -> (i32, i32) {
    %c0_i32 = arith.constant 0 : i32
    %c0_i32_0 = arith.constant 0 : i32
    %c0_i32_1 = arith.constant 0 : i32
    return %c0_i32, %c0_i32_0 : i32, i32
  }
  func.func @transform_2(%arg0: i32) -> (i32, i32) {
    %c0_i32 = arith.constant 0 : i32
    %c0_i32_0 = arith.constant 0 : i32
    %c0_i32_1 = arith.constant 0 : i32
    return %c0_i32, %c0_i32_0 : i32, i32
  }
  func.func @transform_3(%arg0: i32) -> (i32, i32) {
    %c0_i32 = arith.constant 0 : i32
    %c0_i32_0 = arith.constant 0 : i32
    %c0_i32_1 = arith.constant 0 : i32
    return %c0_i32, %c0_i32_0 : i32, i32
  }
  func.func @transform_4(%arg0: i32) -> (i32, i32) {
    %c0_i32 = arith.constant 0 : i32
    %c0_i32_0 = arith.constant 0 : i32
    return %c0_i32, %arg0 : i32, i32
  }
  func.func @transform_5(%arg0: i32) -> (i32, i32) {
    %c0_i32 = arith.constant 0 : i32
    %c0_i32_0 = arith.constant 0 : i32
    return %c0_i32, %arg0 : i32, i32
  }
}

</mosaic_0001>

<bundles_post_ra>
// kernel: tpu_custom_call.1
= control target key start
LH: loop header
LB: loop body
LE: loop exit
PB: predicated region body
PF: predicated region fallthrough
CT: control target
= control target key end

     0   :  { %11 = vsyncpa [#allocation3], 0  ;;  %s325_s0 = inlined_call_operand.hbm [shape: bf16[45,128], index: 0, kind: input, shape index: {}]   ;;  %s326_s1 = inlined_call_operand.vmem [shape: bf16[9,45], index: 1, kind: input, shape index: {}]   ;;  %s327_s2 = inlined_call_operand.vmem [shape: f32[8,1], index: 2, kind: input, shape index: {}]   ;;  %s328_s3 = inlined_call_operand.vmem [shape: f32[8,1], index: 3, kind: input, shape index: {}]   ;;  %s329_s4 = inlined_call_operand.hbm [shape: bf16[8,128], index: 4, kind: output, shape index: {0}]   ;;  %s330_s5 = inlined_call_operand.hbm [shape: f32[1,128], index: 5, kind: output, shape index: {1}]  }
   0x1   :  { %12 = vsyncpa [#allocation4], 0 }
   0x2   :  { %13 = vsyncpa [#allocation7], 0  ;;  %s18_s20 = sshll.u32 %s325_s0, 4  ;;  %s266_s21 = smov [#allocation2]   ;;  %s19_s20 = int_to_ptr.hbm [resolvable:$true] %s18_s20 }
   0x3   :  { %s20_s22 = sshll.u32 %s266_s21, 4  ;;  %s267_s23 = smov 64   ;;  %s21_s22 = int_to_ptr.vmem [resolvable:$true] %s20_s22 }
   0x4   :  { %s268_s24 = smov 4  }
   0x5   :  { %26 = dma.hbm_to_vmem [thread:$0]  %s19_s20, 384, %s21_s22, [#allocation3], %s267_s23, %s267_s23, %s268_s24  }
   0x6   :  { %260 = dma.done.wait [#allocation3], 384  }
   0x7   :  { %261 = vsyncadd [#allocation3], 4294966912  ;;  %vm72_vm0 = vcmask 1045504   ;;  %v269_v0 = vmov 0   ;;  %vm73_vm1 = vcmask 1046528   ;;  %v270_v1 = vmov 65535  }
   0x8   :  { %185 = vset.pattern.permute.xlu0 %v269_v0  ;;  %v74_v2 = vsel %vm72_vm0, 4294967295, %v270_v1  ;;  %v170_v3 = vld [vmem:[#allocation2 + $0x10] sm:$0xf]  ;;  %v176_v4 = vld [vmem:[#allocation2 + $0x10] sm:$0x70]  ;;  %v98_v7 = vld [vmem:[%s328_s3] sm:$0xff] }
   0x9   :  { %v75_v5 = vsel %vm73_vm1, %v74_v2, 0  ;;  %v171_v6 = vor.u32 %v176_v4, %v170_v3  ;;  %v101_v8 = vld [vmem:[%s327_s2] sm:$0xff]  ;;  %v175_v11 = vld [vmem:[#allocation2 + $0x8] sm:$0xff]  ;;  %vm68_vm2 = vcmask 367616   ;;  %s271_s2 = smov [#allocation6]   ;;  %s141_s9 = sshll.u32 %s330_s5, 4  ;;  %s142_s9 = int_to_ptr.hbm [resolvable:$true] %s141_s9 }
   0xa   :  { %v102_v10 = vadd.f32 %v101_v8, %v98_v7  ;;  %v174_v12 = vld [vmem:[#allocation2] sm:$0xff]  ;;  %s139_s3 = sshll.u32 %s271_s2, 4  ;;  %v272_v19 = vmov 1.0   ;;  %s130_s12 = sshll.u32 %s329_s4, 4  ;;  %s140_s3 = int_to_ptr.vmem [resolvable:$true] %s139_s3  ;;  %s131_s12 = int_to_ptr.hbm [resolvable:$true] %s130_s12 }
   0xb   :  { %v77_v9 = vand.u32 %v171_v6, %v75_v5  ;;  %v158_v13 = vld [vmem:[%s326_s1] sm:$0xf]  ;;  %v173_v14 = vld [vmem:[%s326_s1] sm:$0x10]  ;;  %s273_s1 = smov [#allocation5]  }
   0xc   :  { %105 = vperm.xlu0 %185, %v102_v10   ;;  %v159_v15 = vor.u32 %v173_v14, %v158_v13  ;;  %s128_s5 = sshll.u32 %s273_s1, 4  ;;  %s129_s5 = int_to_ptr.vmem [resolvable:$true] %s128_s5 }
   0xd   :  { %84 = vmatpush.bf16.msra.mxu0 %v77_v9 }
  0x11   :  { %85 = vmatpush.bf16.msra.mxu0 %v175_v11 }
  0x14   :  { %114 = vperm.xlu0 %185, %v98_v7  }
  0x15   :  { %86 = vmatpush.bf16.msra.mxu0 %v174_v12 }
  0x18   :  { %172 = vmatmul.msk.bf16.vlgmr.msra.gmra.mxu0 %vm68_vm2, %v159_v15 }
  0x7e   :  { %v106_v21 = vpop.permute.xlu0 %105 }
  0x86   :  { %v115_v30 = vpop.permute.xlu0 %114 }
  0x95   :  { %v88_v16 = vpop.f32.mrf.mxu0 }
  0x9d   :  { %v90_v17 = vpop.f32.mrf.mxu0 }
  0x9e   :  { %vm93_vm3 = vcmp.le.f32.partialorder %v90_v17, 0.0  ;;  %v94_v18 = vadd.f32 1e-08, %v90_v17 }
  0x9f   :  { %v121_v20 = vsel %vm93_vm3, 0.0, %v272_v19  ;;  %v109_v24 = vsel %vm93_vm3, 1, %v269_v0 }
  0xa0   :  { %186 = vrcp.f32 %v94_v18  ;;  %122 = vst [vmem:[#allocation6] sm:$0x1] %v121_v20  ;;  %v110_v27 = vperm.slane %v109_v24, 0 }
  0xa1   :  { %144 = dma.vmem_to_hbm [thread:$0]  %s140_s3, 16, %s142_s9, [#allocation7]  }
  0xa2   :  { %vm111_vm4 = vcmp.eq.s32.totalorder %v110_v27, 1 }
  0xa6   :  { %v187_v22 = vpop.eup %186 }
  0xa7   :  { %v96_v23 = vmul.f32 9.0, %v187_v22 }
  0xa9   :  { %v97_v25 = vsel %vm93_vm3, 0.0, %v96_v23 }
  0xaa   :  { %v99_v26 = vperm.slane %v97_v25, 0 }
  0xac   :  { %v100_v28 = vmul.f32 %v99_v26, %v88_v16 }
  0xae   :  { %v108_v29 = vadd.f32 %v106_v21, %v100_v28 }
  0xb0   :  { %v117_v31 = vsel %vm111_vm4, %v115_v30, %v108_v29 }
  0xb1   :  { %v118_v32 = vmax.f32 %v117_v31, 0.0 }
  0xb3   :  { %v119_v33 = vpack.c.bf16 %v118_v32, %v118_v32 }
  0xb5   :  { %120 = vst [vmem:[#allocation5] sm:$0xf] %v119_v33 }
  0xb6   :  { %133 = dma.vmem_to_hbm [thread:$0]  %s129_s5, 64, %s131_s12, [#allocation4]  }
  0xb7   :  { %262 = dma.done.wait [#allocation4], 64  }
  0xb8   :  { %263 = vsyncadd [#allocation4], 4294967232 }
  0xb9   :  { %264 = dma.done.wait [#allocation7], 16  }
  0xba   :  { %265 = vsyncadd [#allocation7], 4294967280 }
  0xbb   :  { %153 = vsyncpa [#allocation3], 1 }
  0xbc   :  { %154 = vsyncpa [#allocation4], 1 }
  0xbd   :  { %155 = vsyncpa [#allocation7], 1 }

// kernel: tpu_custom_call.1
= control target key start
LH: loop header
LB: loop body
LE: loop exit
PB: predicated region body
PF: predicated region fallthrough
CT: control target
= control target key end

     0   :  { %11 = vsyncpa [#allocation3], 0  ;;  %s325_s0 = inlined_call_operand.hbm [shape: bf16[45,128], index: 0, kind: input, shape index: {}]   ;;  %s326_s1 = inlined_call_operand.vmem [shape: bf16[9,45], index: 1, kind: input, shape index: {}]   ;;  %s327_s2 = inlined_call_operand.vmem [shape: f32[8,1], index: 2, kind: input, shape index: {}]   ;;  %s328_s3 = inlined_call_operand.vmem [shape: f32[8,1], index: 3, kind: input, shape index: {}]   ;;  %s329_s4 = inlined_call_operand.hbm [shape: bf16[8,128], index: 4, kind: output, shape index: {0}]   ;;  %s330_s5 = inlined_call_operand.hbm [shape: f32[1,128], index: 5, kind: output, shape index: {1}]  }
   0x1   :  { %12 = vsyncpa [#allocation4], 0 }
   0x2   :  { %13 = vsyncpa [#allocation7], 0  ;;  %s18_s20 = sshll.u32 %s325_s0, 4  ;;  %s266_s21 = smov [#allocation2]   ;;  %s19_s20 = int_to_ptr.hbm [resolvable:$true] %s18_s20 }
   0x3   :  { %s20_s22 = sshll.u32 %s266_s21, 4  ;;  %s267_s23 = smov 64   ;;  %s21_s22 = int_to_ptr.vmem [resolvable:$true] %s20_s22 }
   0x4   :  { %s268_s24 = smov 4  }
   0x5   :  { %26 = dma.hbm_to_vmem [thread:$0]  %s19_s20, 384, %s21_s22, [#allocation3], %s267_s23, %s267_s23, %s268_s24  }
   0x6   :  { %260 = dma.done.wait [#allocation3], 384  }
   0x7   :  { %261 = vsyncadd [#allocation3], 4294966912  ;;  %vm72_vm0 = vcmask 1045504   ;;  %v269_v0 = vmov 0   ;;  %vm73_vm1 = vcmask 1046528   ;;  %v270_v1 = vmov 65535  }
   0x8   :  { %185 = vset.pattern.permute.xlu0 %v269_v0  ;;  %v74_v2 = vsel %vm72_vm0, 4294967295, %v270_v1  ;;  %v170_v3 = vld [vmem:[#allocation2 + $0x10] sm:$0xf]  ;;  %v176_v4 = vld [vmem:[#allocation2 + $0x10] sm:$0x70]  ;;  %v98_v7 = vld [vmem:[%s328_s3] sm:$0xff] }
   0x9   :  { %v75_v5 = vsel %vm73_vm1, %v74_v2, 0  ;;  %v171_v6 = vor.u32 %v176_v4, %v170_v3  ;;  %v101_v8 = vld [vmem:[%s327_s2] sm:$0xff]  ;;  %v175_v11 = vld [vmem:[#allocation2 + $0x8] sm:$0xff]  ;;  %vm68_vm2 = vcmask 367616   ;;  %s271_s2 = smov [#allocation6]   ;;  %s141_s9 = sshll.u32 %s330_s5, 4  ;;  %s142_s9 = int_to_ptr.hbm [resolvable:$true] %s141_s9 }
   0xa   :  { %v102_v10 = vadd.f32 %v101_v8, %v98_v7  ;;  %v174_v12 = vld [vmem:[#allocation2] sm:$0xff]  ;;  %s139_s3 = sshll.u32 %s271_s2, 4  ;;  %v272_v19 = vmov 1.0   ;;  %s130_s12 = sshll.u32 %s329_s4, 4  ;;  %s140_s3 = int_to_ptr.vmem [resolvable:$true] %s139_s3  ;;  %s131_s12 = int_to_ptr.hbm [resolvable:$true] %s130_s12 }
   0xb   :  { %v77_v9 = vand.u32 %v171_v6, %v75_v5  ;;  %v158_v13 = vld [vmem:[%s326_s1] sm:$0xf]  ;;  %v173_v14 = vld [vmem:[%s326_s1] sm:$0x10]  ;;  %s273_s1 = smov [#allocation5]  }
   0xc   :  { %105 = vperm.xlu0 %185, %v102_v10   ;;  %v159_v15 = vor.u32 %v173_v14, %v158_v13  ;;  %s128_s5 = sshll.u32 %s273_s1, 4  ;;  %s129_s5 = int_to_ptr.vmem [resolvable:$true] %s128_s5 }
   0xd   :  { %84 = vmatpush.bf16.msra.mxu0 %v77_v9 }
  0x11   :  { %85 = vmatpush.bf16.msra.mxu0 %v175_v11 }
  0x14   :  { %114 = vperm.xlu0 %185, %v98_v7  }
  0x15   :  { %86 = vmatpush.bf16.msra.mxu0 %v174_v12 }
  0x18   :  { %172 = vmatmul.msk.bf16.vlgmr.msra.gmra.mxu0 %vm68_vm2, %v159_v15 }
  0x7e   :  { %v106_v21 = vpop.permute.xlu0 %105 }
  0x86   :  { %v115_v30 = vpop.permute.xlu0 %114 }
  0x95   :  { %v88_v16 = vpop.f32.mrf.mxu0 }
  0x9d   :  { %v90_v17 = vpop.f32.mrf.mxu0 }
  0x9e   :  { %vm93_vm3 = vcmp.le.f32.partialorder %v90_v17, 0.0  ;;  %v94_v18 = vadd.f32 1e-08, %v90_v17 }
  0x9f   :  { %v121_v20 = vsel %vm93_vm3, 0.0, %v272_v19  ;;  %v109_v24 = vsel %vm93_vm3, 1, %v269_v0 }
  0xa0   :  { %186 = vrcp.f32 %v94_v18  ;;  %122 = vst [vmem:[#allocation6] sm:$0x1] %v121_v20  ;;  %v110_v27 = vperm.slane %v109_v24, 0 }
  0xa1   :  { %144 = dma.vmem_to_hbm [thread:$0]  %s140_s3, 16, %s142_s9, [#allocation7]  }
  0xa2   :  { %vm111_vm4 = vcmp.eq.s32.totalorder %v110_v27, 1 }
  0xa6   :  { %v187_v22 = vpop.eup %186 }
  0xa7   :  { %v96_v23 = vmul.f32 9.0, %v187_v22 }
  0xa9   :  { %v97_v25 = vsel %vm93_vm3, 0.0, %v96_v23 }
  0xaa   :  { %v99_v26 = vperm.slane %v97_v25, 0 }
  0xac   :  { %v100_v28 = vmul.f32 %v99_v26, %v88_v16 }
  0xae   :  { %v108_v29 = vadd.f32 %v106_v21, %v100_v28 }
  0xb0   :  { %v117_v31 = vsel %vm111_vm4, %v115_v30, %v108_v29 }
  0xb1   :  { %v118_v32 = vmax.f32 %v117_v31, 0.0 }
  0xb3   :  { %v119_v33 = vpack.c.bf16 %v118_v32, %v118_v32 }
  0xb5   :  { %120 = vst [vmem:[#allocation5] sm:$0xf] %v119_v33 }
  0xb6   :  { %133 = dma.vmem_to_hbm [thread:$0]  %s129_s5, 64, %s131_s12, [#allocation4]  }
  0xb7   :  { %262 = dma.done.wait [#allocation4], 64  }
  0xb8   :  { %263 = vsyncadd [#allocation4], 4294967232 }
  0xb9   :  { %264 = dma.done.wait [#allocation7], 16  }
  0xba   :  { %265 = vsyncadd [#allocation7], 4294967280 }
  0xbb   :  { %153 = vsyncpa [#allocation3], 1 }
  0xbc   :  { %154 = vsyncpa [#allocation4], 1 }
  0xbd   :  { %155 = vsyncpa [#allocation7], 1 }

</bundles_post_ra>
